<compile_context>
chip_gen: v7x
topology: tpu7x:2x2x1
jax: 0.10.0
libtpu: 0.0.40
codegen_flags: <defaults>
</compile_context>

<pallas_src>
import functools

import jax
import jax.numpy as jnp
from jax import lax
from jax.experimental import pallas as pl
from jax.experimental.pallas import tpu as pltpu

EPS = 1e-5  # nn.BatchNorm2d default


def _round_up(a, b):
    return ((a + b - 1) // b) * b


# ---------------------------------------------------------------------------
# Pass 1: conv-as-matmul + per-tile BN partial statistics (sum, sum-of-squares)
# ---------------------------------------------------------------------------
def conv_stats_kernel(x_ref, w_ref, y_ref, stats_ref):
    # x_ref: [K, TM]   w_ref: [Cout, K]   y_ref: [Cout, TM]   stats_ref: [1, Cout, 2]
    y = jnp.dot(w_ref[...], x_ref[...], preferred_element_type=jnp.float32)
    y_ref[...] = y
    s1 = jnp.sum(y, axis=1, keepdims=True)       # [Cout, 1]
    s2 = jnp.sum(y * y, axis=1, keepdims=True)   # [Cout, 1]
    stats_ref[0] = jnp.concatenate([s1, s2], axis=1)


# ---------------------------------------------------------------------------
# Pass 2: in-kernel stats combine -> fold gamma/beta -> normalize + ELU
# ---------------------------------------------------------------------------
def norm_elu_kernel(y_ref, stats_ref, gb_ref, out_ref, *, inv_count):
    # y_ref/out_ref: [Cout, TM]   stats_ref: [B*nt, Cout, 2]   gb_ref: [Cout, 2]
    st = jnp.sum(stats_ref[...], axis=0)         # [Cout, 2]  global combine (tiny)
    s1 = st[:, 0:1]
    s2 = st[:, 1:2]
    mean = s1 * inv_count
    var = jnp.maximum(s2 * inv_count - mean * mean, 0.0)   # biased var (training BN)
    inv = lax.rsqrt(var + EPS)
    gamma = gb_ref[:, 0:1]
    beta = gb_ref[:, 1:2]
    scale = gamma * inv
    shift = beta - mean * scale
    z = y_ref[...] * scale + shift
    out_ref[...] = jnp.where(z > 0, z, jnp.expm1(z))       # ELU(alpha=1)


# ---------------------------------------------------------------------------
# im2col in tap-major [B, K, F_out*T] layout (no 5-D transpose copy)
# ---------------------------------------------------------------------------
def _im2col_causal(x, f_out, kh=3, kw=2, stride_f=2):
    """x: [B, Cin, F, T] -> [B, kh*kw*Cin, F_out*T], causal in T (left-pad only).

    K rows ordered (kh, kw, cin); weights are permuted to match instead."""
    B, Cin, F, T = x.shape
    # padding=(0,1) on T plus the [:, :, :, :-1] slice == left-pad T by 1 only.
    x_pad = jnp.pad(x, ((0, 0), (0, 0), (0, 0), (1, 0)))
    cols = []
    for ih in range(kh):
        for iw in range(kw):
            cols.append(x_pad[:, :, ih:ih + stride_f * (f_out - 1) + 1:stride_f, iw:iw + T])
    xc = jnp.stack(cols, axis=1)                 # [B, kh*kw, Cin, F_out, T] (contiguous)
    return xc.reshape(B, kh * kw * Cin, f_out * T)


def causal_conv_block(x, w, b, gamma, beta, *, tile_m=32768):
    """x: [B, Cin, F, T] f32; w: [Cout, Cin, 3, 2]; b/gamma/beta: [Cout].
    Returns [B, Cout, F_out, T], F_out = (F - 3)//2 + 1.

    `b` is accepted for parity with the PyTorch module but not applied: under
    training-mode BatchNorm a per-channel conv bias cancels exactly."""
    del b
    B, Cin, F, T = x.shape
    Cout, _, KH, KW = w.shape
    F_out = (F - KH) // 2 + 1
    Mb = F_out * T                 # per-batch columns
    K = Cin * KH * KW
    count = B * Mb                 # true BN element count per channel

    # ---- tile selection: big lane-dense tiles, balanced, multiple of 128 ---
    tile_m = max(128, (tile_m // 128) * 128)
    mb128 = _round_up(Mb, 128)
    # keep >=2 total grid steps so v7x's two TensorCores both get work even when B == 1
    min_tiles = 2 if (B == 1 and mb128 >= 256) else 1
    nt = max(min_tiles, pl.cdiv(mb128, tile_m))
    tm = _round_up(pl.cdiv(mb128, nt), 128)
    Mb_pad = nt * tm

    x_col = _im2col_causal(x, F_out, KH, KW, 2).astype(jnp.float32)    # [B, K, Mb]
    if Mb_pad > Mb:
        # Zero columns contribute exactly 0 to s1/s2 (no bias), so stats stay exact.
        x_col = jnp.pad(x_col, ((0, 0), (0, 0), (0, Mb_pad - Mb)))
    # tap-major weight layout (kh, kw, cin) matching the im2col row ordering
    w_mat = jnp.transpose(w, (0, 2, 3, 1)).reshape(Cout, K).astype(jnp.float32)
    gb = jnp.stack([gamma, beta], axis=1).astype(jnp.float32)          # [Cout, 2]

    M_tot = B * Mb_pad
    cparams = pltpu.CompilerParams(
        dimension_semantics=("parallel", "parallel"),
        vmem_limit_bytes=32 * 1024 * 1024,  # explicit budget, safe on v5e/v6e/v7x
    )
    cost1 = pl.CostEstimate(
        flops=int(2 * Cout * K * M_tot),
        transcendentals=0,
        bytes_accessed=int(4 * ((K + Cout) * M_tot + Cout * K + B * nt * Cout * 2)),
    )
    cost2 = pl.CostEstimate(
        flops=int(5 * Cout * M_tot),
        transcendentals=int(Cout * M_tot),
        bytes_accessed=int(4 * (2 * Cout * M_tot + B * nt * Cout * 2 + Cout * 2)),
    )

    # ---- pass 1: conv matmul + per-tile partial stats, fully parallel grid --
    y_pad, stats = pl.pallas_call(
        conv_stats_kernel,
        out_shape=(
            jax.ShapeDtypeStruct((B, Cout, Mb_pad), jnp.float32),
            jax.ShapeDtypeStruct((B * nt, Cout, 2), jnp.float32),
        ),
        grid=(B, nt),
        in_specs=[
            pl.BlockSpec((None, K, tm), lambda bb, i: (bb, 0, i)),      # x tile, lane-dense
            pl.BlockSpec((Cout, K), lambda bb, i: (0, 0)),              # weights, resident
        ],
        out_specs=(
            pl.BlockSpec((None, Cout, tm), lambda bb, i: (bb, 0, i)),   # y tile, lane-dense
            pl.BlockSpec((1, Cout, 2), lambda bb, i: (bb * nt + i, 0, 0)),
        ),
        compiler_params=cparams,
        cost_estimate=cost1,
    )(x_col, w_mat)

    # ---- pass 2: in-kernel stats combine + normalize + ELU, NCHW-shaped out -
    out_pad = pl.pallas_call(
        functools.partial(norm_elu_kernel, inv_count=1.0 / count),
        out_shape=jax.ShapeDtypeStruct((B, Cout, Mb_pad), jnp.float32),
        grid=(B, nt),
        in_specs=[
            pl.BlockSpec((None, Cout, tm), lambda bb, i: (bb, 0, i)),
            pl.BlockSpec((B * nt, Cout, 2), lambda bb, i: (0, 0, 0)),   # partial stats, resident
            pl.BlockSpec((Cout, 2), lambda bb, i: (0, 0)),              # gamma/beta, resident
        ],
        out_specs=pl.BlockSpec((None, Cout, tm), lambda bb, i: (bb, 0, i)),
        compiler_params=cparams,
        cost_estimate=cost2,
    )(y_pad, stats, gb)

    # [B, Cout, Mb_pad] -> [B, Cout, F_out, T]  (slice of tail padding + free reshape,
    # no transpose needed since pass 2 already wrote the NCHW-ordered layout)
    return out_pad[:, :, :Mb].reshape(B, Cout, F_out, T)


def causal_conv_block_ref(x, w, b, gamma, beta):
    """Pure-JAX reference matching the PyTorch forward (training-mode BN)."""
    y = lax.conv_general_dilated(
        x, w, window_strides=(2, 1), padding=((0, 0), (1, 1)),
        dimension_numbers=("NCHW", "OIHW", "NCHW"))
    y = y + b[None, :, None, None]
    y = y[:, :, :, :-1]
    mean = jnp.mean(y, axis=(0, 2, 3), keepdims=True)
    var = jnp.mean((y - mean) ** 2, axis=(0, 2, 3), keepdims=True)
    y = (y - mean) * lax.rsqrt(var + EPS)
    y = y * gamma[None, :, None, None] + beta[None, :, None, None]
    return jnp.where(y > 0, y, jnp.expm1(y))


if __name__ == "__main__":
    B, Cin, F, T = 2, 4, 16, 16
    Cout = 8

    key = jax.random.PRNGKey(0)
    kx, kw, kb = jax.random.split(key, 3)
    x = jax.random.normal(kx, (B, Cin, F, T), dtype=jnp.float32)
    fan_in = Cin * 3 * 2
    w = jax.random.normal(kw, (Cout, Cin, 3, 2), dtype=jnp.float32) / jnp.sqrt(fan_in)
    b = 0.01 * jax.random.normal(kb, (Cout,), dtype=jnp.float32)
    gamma = jnp.ones((Cout,), dtype=jnp.float32)
    beta = jnp.zeros((Cout,), dtype=jnp.float32)
    # TODO(synk): BatchNorm running_mean/var state updates are module-state mutation,
    # not part of the returned tensor; only the training-mode forward math is implemented.

    out = causal_conv_block(x, w, b, gamma, beta)
    out = jax.block_until_ready(out)

    ref = causal_conv_block_ref(x, w, b, gamma, beta)
    assert out.shape == (B, Cout, (F - 3) // 2 + 1, T), out.shape
    assert jnp.allclose(out, ref, atol=2e-3, rtol=2e-3), float(jnp.max(jnp.abs(out - ref)))

    print("KERNEL_OK")
</pallas_src>

<mosaic_0001>
module attributes {stable_mosaic.version = 11 : i64} {
  func.func @conv_stats_kernel(%arg0: i32, %arg1: i32, %arg2: memref<1x24x128xf32, #tpu.memory_space<vmem>>, %arg3: memref<8x24xf32, #tpu.memory_space<vmem>>, %arg4: memref<1x8x128xf32, #tpu.memory_space<vmem>>, %arg5: memref<1x8x2xf32, #tpu.memory_space<vmem>>) attributes {dimension_semantics = [#tpu.dimension_semantics<parallel>, #tpu.dimension_semantics<parallel>], iteration_bounds = array<i64: 2, 1>, scalar_prefetch = 0 : i64, scratch_operands = 0 : i64, tpu.core_type = #tpu.core_type<tc>, window_params = [{transform_indices = @transform_0, window_bounds = array<i64: 1, 24, 128>}, {pipeline_mode = #tpu.pipeline_mode<synchronous>, transform_indices = @transform_1, window_bounds = array<i64: 8, 24>}, {transform_indices = @transform_2, window_bounds = array<i64: 1, 8, 128>}, {transform_indices = @transform_3, window_bounds = array<i64: 1, 8, 2>}]} {
    %c0 = arith.constant 0 : index
    %c0_0 = arith.constant 0 : index
    %0 = vector.load %arg3[%c0, %c0_0] : memref<8x24xf32, #tpu.memory_space<vmem>>, vector<8x24xf32>
    %c0_1 = arith.constant 0 : index
    %c0_2 = arith.constant 0 : index
    %c0_3 = arith.constant 0 : index
    %1 = vector.load %arg2[%c0_1, %c0_2, %c0_3] : memref<1x24x128xf32, #tpu.memory_space<vmem>>, vector<1x24x128xf32>
    %2 = vector.shape_cast %1 : vector<1x24x128xf32> to vector<24x128xf32>
    %cst = arith.constant dense<0.000000e+00> : vector<8x128xf32>
    %3 = tpu.matmul %0, %2, %cst {dimension_numbers = #tpu.dot_dimension_numbers<[1], [0], [0], [1], [0, 0, 1, 1], [], []>} : vector<8x24xf32>, vector<24x128xf32>, vector<8x128xf32> -> vector<8x128xf32>
    %c0_4 = arith.constant 0 : index
    %c0_5 = arith.constant 0 : index
    %c0_6 = arith.constant 0 : index
    %4 = vector.load %arg4[%c0_4, %c0_5, %c0_6] : memref<1x8x128xf32, #tpu.memory_space<vmem>>, vector<1x8x128xf32>
    %5 = vector.shape_cast %4 : vector<1x8x128xf32> to vector<8x128xf32>
    %6 = vector.shape_cast %3 : vector<8x128xf32> to vector<1x8x128xf32>
    tpu.vector_store %arg4[%c0_4, %c0_5, %c0_6], %6 {strides = array<i32>} : memref<1x8x128xf32, #tpu.memory_space<vmem>>, vector<1x8x128xf32>,
    %cst_7 = arith.constant dense<0.000000e+00> : vector<8xf32>
    %7 = vector.multi_reduction <add>, %3, %cst_7 [1] : vector<8x128xf32> to vector<8xf32>
    %8 = vector.shape_cast %7 : vector<8xf32> to vector<8x1xf32>
    %9 = arith.mulf %3, %3 : vector<8x128xf32>
    %cst_8 = arith.constant dense<0.000000e+00> : vector<8xf32>
    %10 = vector.multi_reduction <add>, %9, %cst_8 [1] : vector<8x128xf32> to vector<8xf32>
    %11 = vector.shape_cast %10 : vector<8xf32> to vector<8x1xf32>
    %12 = tpu.concatenate %8, %11 in 1 : vector<8x1xf32>, vector<8x1xf32> -> vector<8x2xf32>
    %c0_9 = arith.constant 0 : index
    %c0_10 = arith.constant 0 : index
    %c0_11 = arith.constant 0 : index
    %13 = vector.load %arg5[%c0_9, %c0_10, %c0_11] : memref<1x8x2xf32, #tpu.memory_space<vmem>>, vector<1x8x2xf32>
    %14 = vector.shape_cast %13 : vector<1x8x2xf32> to vector<8x2xf32>
    %15 = vector.shape_cast %12 : vector<8x2xf32> to vector<1x8x2xf32>
    tpu.vector_store %arg5[%c0_9, %c0_10, %c0_11], %15 {strides = array<i32>} : memref<1x8x2xf32, #tpu.memory_space<vmem>>, vector<1x8x2xf32>,
    return
  }
  func.func @transform_0(%arg0: i32, %arg1: i32) -> (i32, i32, i32) {
    %c0_i32 = arith.constant 0 : i32
    %c0_i32_0 = arith.constant 0 : i32
    return %arg0, %c0_i32, %arg1 : i32, i32, i32
  }
  func.func @transform_1(%arg0: i32, %arg1: i32) -> (i32, i32) {
    %c0_i32 = arith.constant 0 : i32
    %c0_i32_0 = arith.constant 0 : i32
    %c0_i32_1 = arith.constant 0 : i32
    return %c0_i32, %c0_i32_0 : i32, i32
  }
  func.func @transform_2(%arg0: i32, %arg1: i32) -> (i32, i32, i32) {
    %c0_i32 = arith.constant 0 : i32
    %c0_i32_0 = arith.constant 0 : i32
    return %arg0, %c0_i32, %arg1 : i32, i32, i32
  }
  func.func @transform_3(%arg0: i32, %arg1: i32) -> (i32, i32, i32) {
    %c1_i32 = arith.constant 1 : i32
    %0 = arith.muli %arg0, %c1_i32 : i32
    %1 = arith.addi %0, %arg1 : i32
    %c0_i32 = arith.constant 0 : i32
    %c0_i32_0 = arith.constant 0 : i32
    %c0_i32_1 = arith.constant 0 : i32
    return %1, %c0_i32, %c0_i32_0 : i32, i32, i32
  }
}

</mosaic_0001>

<bundles_post_ra>
// kernel: tpu_custom_call.1
= control target key start
LH: loop header
LB: loop body
LE: loop exit
PB: predicated region body
PF: predicated region fallthrough
CT: control target
= control target key end

     0   :  { %9 = vsyncpa [#allocation3], 0  ;;  %s968_s0 = inlined_call_operand.hbm [shape: f32[2,24,128], index: 0, kind: input, shape index: {}]   ;;  %s969_s1 = inlined_call_operand.hbm [shape: f32[8,24], index: 1, kind: input, shape index: {}]   ;;  %s970_s2 = inlined_call_operand.hbm [shape: f32[2,8,128], index: 2, kind: output, shape index: {0}]   ;;  %s971_s3 = inlined_call_operand.vmem [shape: f32[2,8,2], index: 3, kind: output, shape index: {1}]  }
   0x1   :  { %11 = vsyncpa [#allocation3 + $0x1], 0 }
   0x2   :  { %12 = vsyncpa [#allocation6], 0 }
   0x3   :  { %13 = vsyncpa [#allocation4], 0 }
   0x4   :  { %15 = vsyncpa [#allocation4 + $0x1], 0  ;;  %s749_s12 = smov 0   ;;  %s751_s13 = smov 0  }
   0x5   :  { %s753_s14 = smov 0   ;;  %s755_s15 = smov 0  }
   0x6   :  { %s757_s16 = smov 0   ;;  %s759_s17 = smov 0  }
   0x7 LB: > { %s463_s18 = sadd.s32 4294967295, %s719_s17   ;;  %s464_s19 = sadd.s32 4294967294, %s719_s17   ;;  %s719_s17 = sphi %s759_s17, %s21_s17   ;;  %s715_s16 = sphi %s757_s16, %s999_s16   ;;  %s711_s15 = sphi %s755_s15, %s998_s15   ;;  %s707_s14 = sphi %s753_s14, %s997_s14   ;;  %s703_s13 = sphi %s751_s13, %s996_s13   ;;  %s699_s12 = sphi %s749_s12, %s995_s12  }
   0x8   : > { %s42_s20 = sadd.s32 1, %s707_s14  ;;  %p49_p0 = scmp.ne.s32.totalorder %s707_s14, %s703_s13 }
   0x9   : > { %p50_p1 = scmp.eq.s32.totalorder %s719_s17, 0  ;;  %p55_p2 = scmp.ne.s32.totalorder %s703_s13, %s699_s12 }
   0xa   : > { %p787_p3 = scmp.eq.s32.totalorder %s463_s18, 0  ;;  %p102_p4 = scmp.eq.s32.totalorder %s463_s18, 1 }
   0xb   : > { %p791_p5 = por %p50_p1, %p49_p0  ;;  %p108_p6 = scmp.eq.s32.totalorder %s464_s19, 1 }
   0xc   : > { %s978_s21 = scalar_select %p787_p3, 1, 0 }
   0xd   : > { %p797_p7 = por %p787_p3, %p55_p2  ;;  %p801_p8 = por %p102_p4, %p49_p0 }
   0xe   : > { %p805_p9 = por %p108_p6, %p55_p2  ;;  %p465_p10 = scmp.ge.s32.totalorder %s719_s17, 1 }
   0xf   : > { %s980_s23 = scalar_select %p797_p7, 1, 0 }
  0x10   : > { %s981_s24 = scalar_select %p801_p8, 1, 0 }
  0x11   : > { %s982_s25 = scalar_select %p805_p9, 1, 0 }
  0x12   : > { %p143_p11 = scmp.lt.s32.totalorder %s719_s17, 3  ;;  %s721_s27 = smov [#allocation5]  }
  0x13   : > { %s156_s28 = sshll.u32 %s721_s27, 4  ;;  %p518_p1 = scmp.lt.s32.totalorder %s719_s17, 2  ;;  %s157_s28 = int_to_ptr.vmem [resolvable:$true] %s156_s28 }
  0x14   : > { %p812_p13 = pnand %p465_p10, %p143_p11  ;;  %s33_s4 = sadd.s32 1, %s715_s16 }
  0x15   : > { %p821_p4 = pnand %p518_p1, %p791_p5  ;;  %p832_p6 = scmp.ge.s32.totalorder %s33_s4, 2 }
  0x16   : > { %s983_s26 = scalar_select %p812_p13, 1, 0 }
  0x17   : > { %p505_p0 = pneg %p812_p13  ;;  %s167_s6 = sand.u32 1, %s707_s14  }
  0x18   : > { %s984_s29 = scalar_select %p821_p4, 1, 0 }
  0x19   : > { %p827_p2 = pnand %p505_p0, %p787_p3  ;;  %s575_s9 = scalar_lea.hbm %s969_s1, 128 }
  0x1a   : > { %s986_s5 = scalar_select %p832_p6, 1, 0 }
  0x1b   : > { %p576_p5 = scmp.ne.s32.totalorder %s969_s1, %s575_s9  ;;  %p577_p10 = pneg %p827_p2 }
  0x1c   : > { %p582_p0 = scmp.lt.u32.totalorder %s575_s9, %s969_s1 }
  0x1d   : > { %p578_p11 = pnand %p577_p10, %p576_p5 }
  0x1f   : > { %p579_p1 = pneg %p578_p11 }
  0x21   : > { %p584_p12 = pnand %p582_p0, %p579_p1 }
  0x23   : > { %587 = shalt.err (!%p584_p12)
}
  0x24   : > { %s588_s22 = scalar_lea.vmem %s157_s28, 128  ;;  %p596_p7 = scmp.lt.s32.totalorder %s157_s28, %s157_s28 }
  0x25   : > { %p589_p9 = scmp.ne.s32.totalorder %s157_s28, %s588_s22  ;;  %p597_p13 = scmp.lt.s32.totalorder %s588_s22, %s588_s22 }
  0x27   : > { %p591_p8 = pnand %p589_p9, %p577_p10  ;;  %p598_p4 = por %p597_p13, %p596_p7 }
  0x29   : > { %p592_p3 = pneg %p591_p8 }
  0x2b   : > { %p599_p6 = pnand %p598_p4, %p592_p3 }
  0x2d   : > { %602 = shalt.err (!%p599_p6)
}
  0x2e   : > { %508 = dma.hbm_to_vmem [thread:$0]  (!%p827_p2), %s969_s1, 128, %s157_s28, [#allocation6]  }
  0x2f   : > { %p987_p9 = scmp.ne.s32.totalorder %s986_s5, 0  ;;  %s494_s8 = smul.u32 24, %s167_s6 }
  0x30   : > { %s495_s10 = smul.u32 384, %s715_s16  ;;  %s872_s5 = scalar_lea.sflag [#allocation3], %s167_s6 }
  0x31   : > { %s1001_s4 = smov (%p987_p9, %s33_s4), 0  ;;  %s171_s19 = scalar_lea.vmem [#allocation2], %s494_s8 }
  0x32   : > { %s37_s9 = ssub.s32 %s715_s16, %s1001_s4  ;;  %s863_s18 = scalar_lea.hbm %s968_s0, %s495_s10 }
  0x33   : > { %p40_p3 = scmp.eq.s32.totalorder %s37_s9, 0  ;;  %s179_s22 = sshll.u32 %s171_s19, 4  ;;  %s870_s22 = int_to_ptr.vmem [resolvable:$true] %s179_s22 }
  0x34   : > { %s603_s27 = scalar_lea.hbm %s863_s18, 384  ;;  %p988_p8 = scmp.ne.s32.totalorder %s984_s29, 0 }
  0x35   : > { %s868_s28 = scalar_select %p40_p3, %s707_s14, %s42_s20  }
  0x36   : > { %p604_p7 = scmp.ne.s32.totalorder %s863_s18, %s603_s27  ;;  %p605_p12 = pneg %p988_p8 }
  0x37   : > { %s608_s8 = scalar_lea.hbm %s968_s0, 768  ;;  %p609_p2 = scmp.lt.u32.totalorder %s863_s18, %s968_s0 }
  0x38   : > { %p606_p13 = pnand %p605_p12, %p604_p7  ;;  %p610_p6 = scmp.lt.u32.totalorder %s608_s8, %s603_s27 }
  0x39   : > { %p612_p10 = scmp.lt.u32.totalorder %s603_s27, %s863_s18 }
  0x3a   : > { %p607_p4 = pneg %p606_p13  ;;  %p611_p5 = por %p610_p6, %p609_p2 }
  0x3c   : > { %p613_p11 = por %p612_p10, %p611_p5 }
  0x3e   : > { %p614_p1 = pnand %p613_p11, %p607_p4 }
  0x40   : > { %617 = shalt.err (!%p614_p1)
}
  0x41   : > { %s618_s20 = scalar_lea.vmem %s870_s22, 384  ;;  %s722_s6 = smov [#allocation2]  }
  0x42   : > { %p619_p0 = scmp.ne.s32.totalorder %s870_s22, %s618_s20  ;;  %s623_s11 = sshll.u32 %s722_s6, 4  ;;  %s624_s11 = int_to_ptr.vmem [resolvable:$false] %s623_s11 }
  0x43   : > { %s625_s19 = scalar_lea.vmem %s624_s11, 768  ;;  %p626_p7 = scmp.lt.s32.totalorder %s870_s22, %s624_s11 }
  0x44   : > { %p621_p9 = pnand %p619_p0, %p605_p12  ;;  %p627_p13 = scmp.lt.s32.totalorder %s625_s19, %s618_s20 }
  0x46   : > { %p622_p3 = pneg %p621_p9  ;;  %p628_p2 = por %p627_p13, %p626_p7 }
  0x48   : > { %p629_p6 = pnand %p628_p2, %p622_p3 }
  0x4a   : > { %632 = shalt.err (!%p629_p6)
}
  0x4b   : > { %s723_s27 = smov 128   ;;  %s724_s7 = smov 8  }
  0x4c   : > { %512 = dma.hbm_to_vmem [thread:$0]  (!%p988_p8), %s863_s18, 384, %s870_s22, %s872_s5, %s723_s27, %s723_s27, %s724_s7  }
  0x4d   : > { %p989_p12 = scmp.ne.s32.totalorder %s983_s26, 0 }
  0x4e   : > { %s903_s9 = sand.u32 (!%p989_p12), 1, %s703_s13   ;;  %p990_p4 = scmp.ne.s32.totalorder (!%p989_p12), %s980_s23, 0 }
  0x4f   : > { %191 = sbr.rel (%p989_p12) target bundleno = 459 (0x1cb), region = 28  ;;  %s194_s10 = scalar_lea.sflag (!%p989_p12), [#allocation3], %s903_s9 }
  0x50   : > { %s496_s8 = smul.u32 (!%p989_p12), 24, %s903_s9 }
  0x52   : > { %s197_s30 = scalar_lea.vmem (!%p989_p12), [#allocation2], %s496_s8 }
  0x56   : > { %686 = dma.done.wait (%p990_p4), %s194_s10, 384  }
  0x57   : > { %688 = vsyncadd (%p990_p4), %s194_s10, 4294966912  ;;  %p991_p5 = scmp.ne.s32.totalorder %s978_s21, 0 }
  0x59   : > { %690 = dma.done.wait (%p991_p5), [#allocation6], 128  }
  0x5a   : > { %692 = vsyncadd (%p991_p5), [#allocation6], 4294967168  ;;  %v725_v0 = vmov 0.0|0.0   ;;  %vm726_vm0 = vmmov 0   ;;  %v727_v1 = vmov 0.0   ;;  %v236_v2 = vld [vmem:[%s197_s30] sm:$0xff] }
  0x5b   : > { %491 = vmatprep.subr.bf16.mxu0 %v725_v0  ;;  %488 = vmatprep.mubr.msk.f32.mxu0 %vm726_vm0, %v727_v1  ;;  %v237_v3 = vld [vmem:[%s197_s30 + $0x8] sm:$0xff]  ;;  %v238_v5 = vld [vmem:[%s197_s30 + $0x10] sm:$0xff]  ;;  %vm239_vm1 = vcmask 195584   ;;  %s471_s21 = sshll.u32 %s903_s9, 3  ;;  %s475_s26 = sshll.u32 %s711_s15, 7 }
  0x5c   : > { %v492_v4 = vpack.c.bf16 %v237_v3, %v236_v2  ;;  %v235_v6 = vld [vmem:[#allocation5] sm:$0xff]  ;;  %s221_s23 = scalar_lea.vmem [#allocation7], %s471_s21  ;;  %s920_s22 = scalar_lea.hbm %s970_s2, %s475_s26 }
  0x5d   : > { %s343_s5 = sshll.u32 %s221_s23, 4  ;;  %s324_s20 = scalar_lea.sflag [#allocation4], %s903_s9  ;;  %s344_s5 = int_to_ptr.vmem [resolvable:$true] %s343_s5 }
  0x5e   : > { %493 = vmatpush3.bf16.msra.mxu0 %v492_v4  ;;  %s633_s6 = scalar_lea.vmem %s344_s5, 128  ;;  %p992_p10 = scmp.ne.s32.totalorder %s981_s24, 0 }
  0x5f   : > { %486 = vmatprep.subr.mxu0 %v727_v1  ;;  %p634_p8 = scmp.ne.s32.totalorder %s344_s5, %s633_s6  ;;  %s728_s11 = smov [#allocation7]  }
  0x60   : > { %s637_s19 = sshll.u32 %s728_s11, 4  ;;  %s638_s19 = int_to_ptr.vmem [resolvable:$false] %s637_s19 }
  0x61   : > { %p635_p11 = pnand %p634_p8, %p992_p10  ;;  %s639_s27 = scalar_lea.vmem %s638_s19, 256 }
  0x62   : > { %487 = vmatpush3.msra.mxu0 %v238_v5  ;;  %p640_p0 = scmp.lt.s32.totalorder %s344_s5, %s638_s19  ;;  %p641_p9 = scmp.lt.s32.totalorder %s639_s27, %s633_s6 }
  0x63   : > { %489 = vmatmul.mubr.msk.f32.vlgmr.msra.gmra.mrb[0].mxu0 %vm239_vm1, %v235_v6  ;;  %p636_p1 = pneg %p635_p11 }
  0x64   : > { %p642_p3 = por %p641_p9, %p640_p0 }
  0x66   : > { %p643_p7 = pnand %p642_p3, %p636_p1 }
 0x136   : > { %v309_v7 = vpop.f32.mrb[0].mxu0 }
 0x137   : > { %313 = vst [vmem:[%s221_s23] sm:$0xff] %v309_v7  ;;  %314 = vadd.xlane.f32.xlu0 %v309_v7  ;;  %v490_v8 = vpop.f32.mrb[1].mxu0  ;;  %v316_v9 = vmul.f32 %v309_v7, %v309_v7 }
 0x13b   : > { %317 = vadd.xlane.f32.xlu0 %v316_v9 }
 0x13c   : > { %646 = shalt.err (!%p643_p7)
}
 0x13d   : > { %s647_s7 = scalar_lea.hbm %s920_s22, 128  ;;  %s651_s10 = scalar_lea.hbm %s970_s2, 256 }
 0x13e   : > { %p648_p13 = scmp.ne.s32.totalorder %s920_s22, %s647_s7  ;;  %p652_p12 = scmp.lt.u32.totalorder %s920_s22, %s970_s2 }
 0x13f   : > { %p653_p4 = scmp.lt.u32.totalorder %s651_s10, %s647_s7  ;;  %p655_p8 = scmp.lt.u32.totalorder %s647_s7, %s920_s22 }
 0x140   : > { %p649_p2 = pnand %p648_p13, %p992_p10 }
 0x141   : > { %p654_p5 = por %p653_p4, %p652_p12 }
 0x142   : > { %p650_p6 = pneg %p649_p2 }
 0x143   : > { %p656_p11 = por %p655_p8, %p654_p5 }
 0x145   : > { %p657_p1 = pnand %p656_p11, %p650_p6 }
 0x147   : > { %660 = shalt.err (!%p657_p1)
}
 0x148   : > { %503 = dma.vmem_to_hbm [thread:$0]  (%p992_p10), %s344_s5, 128, %s920_s22, %s324_s20   ;;  %vm319_vm2 = vcmask 7168   ;;  %vm321_vm3 = vcmask 15360  }
 0x149   : > { %p230_p0 = scmp.lt.s32.totalorder %s711_s15, 1 }
 0x14b   : > { %s1003_s15 = smov (!%p230_p0, %s711_s15), 1 }
 0x14c   : > { %s472_s23 = sshll.u32 %s1003_s15, 3 }
 0x14d   : > { %s233_s18 = scalar_lea.vmem %s971_s3, %s472_s23 }
 0x1c4   : > { %v315_v10 = vpop.xlane.xlu0 %314 }
 0x1c8   : > { %v318_v11 = vpop.xlane.xlu0 %317 }
 0x1c9   : > { %v320_v12 = vsel %vm319_vm2, %v315_v10, %v318_v11 }
 0x1ca   : > { %322 = vst.msk [vmem:[%s233_s18] sm:$0xff] %vm321_vm3, %v320_v12 }
 0x1cb PF: > { %s359_s24 = sand.u32 1, %s699_s12   ;;  %p993_p9 = scmp.ne.s32.totalorder %s982_s25, 0 }
 0x1cc   : > { %p994_p10 = scmp.ge.s32.totalorder %s719_s17, 2  ;;  %s360_s22 = scalar_lea.sflag [#allocation4], %s359_s24 }
 0x1ce   : > { %p514_p3 = pnand %p994_p10, %p993_p9 }
 0x1d0   : > { %694 = dma.done.wait (!%p514_p3), %s360_s22, 128  }
 0x1d1   : > { %696 = vsyncadd (!%p514_p3), %s360_s22, 4294967168  ;;  %s21_s17 = sadd.s32 1, %s719_s17   ;;  %s995_s12 = smov %s703_s13 }
 0x1d2   : > { %p18_p7 = scmp.ge.s32.totalorder %s21_s17, 4   ;;  %s996_s13 = smov %s707_s14 }
 0x1d3   : > { %s997_s14 = smov %s868_s28  ;;  %s998_s15 = smov %s715_s16 }
 0x1d4   : > { %s999_s16 = smov %s1001_s4  ;;  %20 = sbr.rel (!%p18_p7) target bundleno = 7 (0x7), region = 89 }
 0x1db   :  { %373 = vsyncpa [#allocation3], 1 }
 0x1dc   :  { %375 = vsyncpa [#allocation3 + $0x1], 1 }
 0x1dd   :  { %376 = vsyncpa [#allocation6], 1 }
 0x1de   :  { %377 = vsyncpa [#allocation4], 1 }
 0x1df   :  { %379 = vsyncpa [#allocation4 + $0x1], 1 }

</bundles_post_ra>
